<compile_context>
chip_gen: v7x
topology: tpu7x:2x2x1
jax: 0.10.0
libtpu: 0.0.40
codegen_flags: <defaults>
</compile_context>

<pallas_src>
import functools
import math

import jax
import jax.numpy as jnp
from jax.experimental import pallas as pl
from jax.experimental.pallas import tpu as pltpu


# ----------------------------- in-kernel helpers -----------------------------

def _gelu_tanh(x):
    # matches torch.nn.GELU(approximate='tanh')
    c = math.sqrt(2.0 / math.pi)
    return 0.5 * x * (1.0 + jnp.tanh(c * (x + 0.044715 * x * x * x)))


def _layernorm(x, w, b, eps=1e-5):
    mu = jnp.mean(x, axis=-1, keepdims=True)
    xc = x - mu
    var = jnp.mean(xc * xc, axis=-1, keepdims=True)
    return xc * jax.lax.rsqrt(var + eps) * w + b


def _round_up(n, m):
    return ((n + m - 1) // m) * m


def _pick_vmem_limit(default_bytes=48 * 1024 * 1024):
    """Per-generation VMEM budget: ~3/4 of physical, capped at 100 MiB.
    128 MiB parts (v5e/v6e) -> 96 MiB, 64 MiB parts (v7x) -> 48 MiB."""
    try:
        cap = int(getattr(pltpu.get_tpu_info(), "vmem_capacity_bytes", 0))
    except Exception:
        return default_bytes
    if cap <= 0:
        return default_bytes
    return min(100 * 1024 * 1024, (cap * 3) // 4)


# ------------------------- kernel 1: LN1 + QKV proj --------------------------

def ln_qkv_kernel(x_ref, ln1w_ref, ln1b_ref, attnw_ref, attnb_ref,
                  q_ref, k_ref, v_ref, *, scale):
    x = x_ref[0]                                      # (t_row, C) f32
    C = x.shape[-1]
    h1 = _layernorm(x, ln1w_ref[0], ln1b_ref[0])      # f32
    qkv = jnp.dot(h1.astype(jnp.bfloat16), attnw_ref[...],
                  preferred_element_type=jnp.float32) + attnb_ref[0]
    # fold 1/sqrt(hd) into q once (a (t,C) multiply, not a (t,T) one per tile)
    q_ref[0] = (qkv[:, 0:C] * scale).astype(jnp.bfloat16)
    k_ref[0] = qkv[:, C:2 * C].astype(jnp.bfloat16)
    v_ref[0] = qkv[:, 2 * C:3 * C].astype(jnp.bfloat16)


# ------------------- kernel 2: causal flash attention ------------------------

def flash_attn_kernel(q_ref, k_ref, v_ref, y_ref, *, n_head, kv_mult):
    qi = pl.program_id(1)
    q_all = q_ref[0]                                  # (t, C) bf16, pre-scaled
    t, C = q_all.shape
    hd = C // n_head
    Tpad = k_ref.shape[1]
    kv_t = kv_mult * t
    neg = jnp.float32(-1e30)                          # finite: padded rows never NaN

    # local causal mask for the diagonal tile (shared across heads)
    row = jax.lax.broadcasted_iota(jnp.int32, (t, t), 0)
    col = jax.lax.broadcasted_iota(jnp.int32, (t, t), 1)
    diag_mask = row >= col

    # Static loop over heads: per-head work is plain 2-D MXU matmuls on lane
    # slices of the channel-major tiles; no head-major relayout is ever needed.
    for h in range(n_head):
        lo, hi = h * hd, (h + 1) * hd
        q = q_all[:, lo:hi]                           # (t, hd)

        def attend(carry, kt, vt, mask):
            m, l, acc = carry
            s = jnp.einsum("qd,kd->qk", q, kt,
                           preferred_element_type=jnp.float32)       # (t, kv) f32
            if mask is not None:
                s = jnp.where(mask, s, neg)
            m_new = jnp.maximum(m, jnp.max(s, axis=-1, keepdims=True))
            alpha = jnp.exp(m - m_new)
            p = jnp.exp(s - m_new)
            l_new = alpha * l + jnp.sum(p, axis=-1, keepdims=True)
            acc_new = alpha * acc + jnp.dot(p.astype(vt.dtype), vt,
                                            preferred_element_type=jnp.float32)
            return m_new, l_new, acc_new

        carry = (jnp.full((t, 1), -jnp.inf, jnp.float32),
                 jnp.zeros((t, 1), jnp.float32),
                 jnp.zeros((t, hd), jnp.float32))

        # (a) wide (kv_mult*t) unmasked tiles strictly below the diagonal:
        #     wider N/K fills the 256-wide MXU (v6e/v7x) and halves the VPU
        #     softmax bookkeeping and loop overhead per KV element.
        if kv_mult > 1 and Tpad >= kv_t:
            def wide_body(kj, c):
                start = pl.multiple_of(kj * kv_t, kv_t)
                kt = k_ref[0, pl.ds(start, kv_t), lo:hi]
                vt = v_ref[0, pl.ds(start, kv_t), lo:hi]
                return attend(c, kt, vt, None)
            carry = jax.lax.fori_loop(0, qi // kv_mult, wide_body, carry)

        # (b) leftover t-wide unmasked tiles below the diagonal
        #     (0..kv_mult-1 iterations; the whole loop when kv_mult == 1).
        tail_lo = 0 if kv_mult == 1 else (qi // kv_mult) * kv_mult

        def tail_body(kj, c):
            start = pl.multiple_of(kj * t, t)
            kt = k_ref[0, pl.ds(start, t), lo:hi]
            vt = v_ref[0, pl.ds(start, t), lo:hi]
            return attend(c, kt, vt, None)
        carry = jax.lax.fori_loop(tail_lo, qi, tail_body, carry)

        # (c) diagonal tile: the only masked one.
        dstart = pl.multiple_of(qi * t, t)
        kt = k_ref[0, pl.ds(dstart, t), lo:hi]
        vt = v_ref[0, pl.ds(dstart, t), lo:hi]
        m, l, acc = attend(carry, kt, vt, diag_mask)

        inv_l = pl.reciprocal(l, approx=True)         # EUP divide (free-ish)
        # channel-major, lane-dense output tile; per-head lane-slice store.
        y_ref[0, :, lo:hi] = (acc * inv_l).astype(y_ref.dtype)


# -------------- kernel 3: out-proj + residual + LN2 + MLP + residual ---------

def proj_mlp_kernel(x_ref, y_ref,
                    projw_ref, projb_ref, ln2w_ref, ln2b_ref,
                    fcw_ref, fcb_ref, mprojw_ref, mprojb_ref, out_ref):
    x = x_ref[0]                                      # (t_row, C) f32 residual
    att = jnp.dot(y_ref[0], projw_ref[...],
                  preferred_element_type=jnp.float32) + projb_ref[0]
    x1 = x + att

    h2 = _layernorm(x1, ln2w_ref[0], ln2b_ref[0])
    f = jnp.dot(h2.astype(jnp.bfloat16), fcw_ref[...],
                preferred_element_type=jnp.float32) + fcb_ref[0]
    f = _gelu_tanh(f)                                 # f32 elementwise (v5e-safe)
    mo = jnp.dot(f.astype(jnp.bfloat16), mprojw_ref[...],
                 preferred_element_type=jnp.float32) + mprojb_ref[0]
    out_ref[0] = x1 + mo


# --------------------------------- wrapper -----------------------------------

def block_forward(x, params, n_head, *, kv_mult=2):
    # kv_mult=2 -> 256-wide unmasked KV tiles (best for v6e/v7x 2x256x256 MXUs);
    # set kv_mult=1 on v5e (128x128 MXU) if desired.
    B, T, C = x.shape
    assert C % n_head == 0
    hd = C // n_head
    scale = 1.0 / math.sqrt(hd)
    bf16 = jnp.bfloat16

    # Attention query tile t_q = 128; stages 1/3 use a larger row tile (256) to
    # fill the MXU M-dim and amortize per-grid-step overhead.  Tiny sequences
    # use a single (8-padded) tile.  Padded rows are sliced off at the end.
    if T <= 128:
        t_q = t_row = _round_up(T, 8)
        Tpad = t_q
    else:
        t_q, t_row = 128, 256
        Tpad = _round_up(T, t_row)
    nq = Tpad // t_q
    n_row = Tpad // t_row
    xp = jnp.pad(x, ((0, 0), (0, Tpad - T), (0, 0))) if Tpad != T else x

    # bf16 weights: MXU-native and halves resident VMEM footprint.
    attn_w = params["attn_w"].astype(bf16)
    proj_w = params["proj_w"].astype(bf16)
    fc_w = params["fc_w"].astype(bf16)
    mproj_w = params["mproj_w"].astype(bf16)

    cparams = pltpu.CompilerParams(
        dimension_semantics=("parallel", "parallel"),
        vmem_limit_bytes=_pick_vmem_limit())

    row_spec = pl.BlockSpec((1, t_row, C), lambda b, ri: (b, ri, 0))

    def full_spec(a):                 # whole (small) param resident in VMEM
        return pl.BlockSpec(a.shape, lambda b, ri: (0,) * a.ndim)

    # ---- stage 1: LayerNorm1 + fused QKV projection (channel-major outputs) --
    q, k, v = pl.pallas_call(
        functools.partial(ln_qkv_kernel, scale=scale),
        out_shape=tuple(jax.ShapeDtypeStruct((B, Tpad, C), bf16) for _ in range(3)),
        grid=(B, n_row),
        in_specs=[row_spec,
                  full_spec(params["ln1_w"]), full_spec(params["ln1_b"]),
                  full_spec(attn_w), full_spec(params["attn_b"])],
        out_specs=tuple(pl.BlockSpec((1, t_row, C), lambda b, ri: (b, ri, 0))
                        for _ in range(3)),
        compiler_params=cparams,
    )(xp, params["ln1_w"], params["ln1_b"], attn_w, params["attn_b"])

    # ---- stage 2: causal flash attention (channel-major in and out) ----------
    q_spec = pl.BlockSpec((1, t_q, C), lambda b, qi: (b, qi, 0))
    kv_spec = pl.BlockSpec((1, Tpad, C), lambda b, qi: (b, 0, 0))
    y = pl.pallas_call(
        functools.partial(flash_attn_kernel, n_head=n_head, kv_mult=kv_mult),
        out_shape=jax.ShapeDtypeStruct((B, Tpad, C), bf16),
        grid=(B, nq),
        in_specs=[q_spec, kv_spec, kv_spec],
        out_specs=q_spec,
        compiler_params=cparams,
    )(q, k, v)

    # ---- stage 3: out-proj + residual, LN2 + MLP + residual ------------------
    out = pl.pallas_call(
        proj_mlp_kernel,
        out_shape=jax.ShapeDtypeStruct((B, Tpad, C), jnp.float32),
        grid=(B, n_row),
        in_specs=[row_spec, row_spec,
                  full_spec(proj_w), full_spec(params["proj_b"]),
                  full_spec(params["ln2_w"]), full_spec(params["ln2_b"]),
                  full_spec(fc_w), full_spec(params["fc_b"]),
                  full_spec(mproj_w), full_spec(params["mproj_b"])],
        out_specs=row_spec,
        compiler_params=cparams,
    )(xp, y, proj_w, params["proj_b"], params["ln2_w"], params["ln2_b"],
      fc_w, params["fc_b"], mproj_w, params["mproj_b"])

    return out[:, :T, :] if Tpad != T else out


# ------------------------- plain-JAX reference (checking) --------------------

def block_reference(x, params, n_head):
    B, T, C = x.shape
    hd = C // n_head

    def ln(v, w, b):
        mu = jnp.mean(v, -1, keepdims=True)
        var = jnp.mean((v - mu) ** 2, -1, keepdims=True)
        return (v - mu) * jax.lax.rsqrt(var + 1e-5) * w + b

    h1 = ln(x, params["ln1_w"][0], params["ln1_b"][0])
    qkv = h1 @ params["attn_w"] + params["attn_b"][0]
    q, k, v = jnp.split(qkv, 3, axis=-1)
    q = q.reshape(B, T, n_head, hd).transpose(0, 2, 1, 3)
    k = k.reshape(B, T, n_head, hd).transpose(0, 2, 1, 3)
    v = v.reshape(B, T, n_head, hd).transpose(0, 2, 1, 3)
    s = jnp.einsum("bhqd,bhkd->bhqk", q, k) / math.sqrt(hd)
    mask = jnp.tril(jnp.ones((T, T), dtype=bool))
    s = jnp.where(mask, s, -jnp.inf)
    p = jax.nn.softmax(s, axis=-1)
    y = jnp.einsum("bhqk,bhkd->bhqd", p, v).transpose(0, 2, 1, 3).reshape(B, T, C)
    x1 = x + (y @ params["proj_w"] + params["proj_b"][0])

    h2 = ln(x1, params["ln2_w"][0], params["ln2_b"][0])
    f = h2 @ params["fc_w"] + params["fc_b"][0]
    c = math.sqrt(2.0 / math.pi)
    f = 0.5 * f * (1.0 + jnp.tanh(c * (f + 0.044715 * f ** 3)))
    return x1 + (f @ params["mproj_w"] + params["mproj_b"][0])


# ----------------------------------- main -------------------------------------

def _make_params(key, C):
    keys = jax.random.split(key, 4)
    return {
        "ln1_w":   jnp.ones((1, C), jnp.float32),
        "ln1_b":   jnp.zeros((1, C), jnp.float32),
        "attn_w":  0.02 * jax.random.normal(keys[0], (C, 3 * C), jnp.float32),
        "attn_b":  jnp.zeros((1, 3 * C), jnp.float32),
        "proj_w":  0.02 * jax.random.normal(keys[1], (C, C), jnp.float32),
        "proj_b":  jnp.zeros((1, C), jnp.float32),
        "ln2_w":   jnp.ones((1, C), jnp.float32),
        "ln2_b":   jnp.zeros((1, C), jnp.float32),
        "fc_w":    0.02 * jax.random.normal(keys[2], (C, 4 * C), jnp.float32),
        "fc_b":    jnp.zeros((1, 4 * C), jnp.float32),
        "mproj_w": 0.02 * jax.random.normal(keys[3], (4 * C, C), jnp.float32),
        "mproj_b": jnp.zeros((1, C), jnp.float32),
    }


def _check(B, T, C, n_head, key):
    kp, kx = jax.random.split(key)
    params = _make_params(kp, C)
    x = jax.random.normal(kx, (B, T, C), jnp.float32)

    out = jax.block_until_ready(block_forward(x, params, n_head))
    ref = jax.block_until_ready(block_reference(x, params, n_head))
    assert out.shape == (B, T, C)
    # bf16 MXU operands -> tolerance looser than a pure-f32 check.
    err = float(jnp.max(jnp.abs(out - ref)))
    assert jnp.allclose(out, ref, atol=2e-2, rtol=2e-2), (
        f"mismatch vs JAX reference (max abs err {err})")


if __name__ == "__main__":
    root = jax.random.PRNGKey(0)
    k1, k2, k3 = jax.random.split(root, 3)

    # small toy config (single query tile, single row tile)
    _check(B=2, T=8, C=32, n_head=4, key=k1)
    # multi-tile: padding (T=200 -> Tpad=256), two 128-row q tiles, one 256-row
    # tile for stages 1/3, causal tile skipping.
    _check(B=2, T=200, C=128, n_head=4, key=k2)
    # larger multi-tile: exercises the 256-wide unmasked KV loop (Tpad=512,
    # four q tiles, two row tiles).
    _check(B=2, T=300, C=128, n_head=4, key=k3)

    print("KERNEL_OK")
</pallas_src>

<mosaic_0001>
module attributes {stable_mosaic.version = 11 : i64} {
  func.func @ln_qkv_kernel(%arg0: i32, %arg1: i32, %arg2: memref<1x8x32xf32, #tpu.memory_space<vmem>>, %arg3: memref<1x32xf32, #tpu.memory_space<vmem>>, %arg4: memref<1x32xf32, #tpu.memory_space<vmem>>, %arg5: memref<32x96xbf16, #tpu.memory_space<vmem>>, %arg6: memref<1x96xf32, #tpu.memory_space<vmem>>, %arg7: memref<1x8x32xbf16, #tpu.memory_space<vmem>>, %arg8: memref<1x8x32xbf16, #tpu.memory_space<vmem>>, %arg9: memref<1x8x32xbf16, #tpu.memory_space<vmem>>) attributes {dimension_semantics = [#tpu.dimension_semantics<parallel>, #tpu.dimension_semantics<parallel>], iteration_bounds = array<i64: 2, 1>, scalar_prefetch = 0 : i64, scratch_operands = 0 : i64, tpu.core_type = #tpu.core_type<tc>, window_params = [{transform_indices = @transform_0, window_bounds = array<i64: 1, 8, 32>}, {pipeline_mode = #tpu.pipeline_mode<synchronous>, transform_indices = @transform_1, window_bounds = array<i64: 1, 32>}, {pipeline_mode = #tpu.pipeline_mode<synchronous>, transform_indices = @transform_2, window_bounds = array<i64: 1, 32>}, {pipeline_mode = #tpu.pipeline_mode<synchronous>, transform_indices = @transform_3, window_bounds = array<i64: 32, 96>}, {pipeline_mode = #tpu.pipeline_mode<synchronous>, transform_indices = @transform_4, window_bounds = array<i64: 1, 96>}, {transform_indices = @transform_5, window_bounds = array<i64: 1, 8, 32>}, {transform_indices = @transform_6, window_bounds = array<i64: 1, 8, 32>}, {transform_indices = @transform_7, window_bounds = array<i64: 1, 8, 32>}]} {
    %c0 = arith.constant 0 : index
    %c0_0 = arith.constant 0 : index
    %c0_1 = arith.constant 0 : index
    %0 = vector.load %arg2[%c0, %c0_0, %c0_1] : memref<1x8x32xf32, #tpu.memory_space<vmem>>, vector<1x8x32xf32>
    %1 = vector.shape_cast %0 : vector<1x8x32xf32> to vector<8x32xf32>
    %c0_2 = arith.constant 0 : index
    %c0_3 = arith.constant 0 : index
    %2 = vector.load %arg3[%c0_2, %c0_3] : memref<1x32xf32, #tpu.memory_space<vmem>>, vector<1x32xf32>
    %3 = vector.shape_cast %2 : vector<1x32xf32> to vector<32xf32>
    %c0_4 = arith.constant 0 : index
    %c0_5 = arith.constant 0 : index
    %4 = vector.load %arg4[%c0_4, %c0_5] : memref<1x32xf32, #tpu.memory_space<vmem>>, vector<1x32xf32>
    %5 = vector.shape_cast %4 : vector<1x32xf32> to vector<32xf32>
    %cst = arith.constant dense<0.000000e+00> : vector<8xf32>
    %6 = vector.multi_reduction <add>, %1, %cst [1] : vector<8x32xf32> to vector<8xf32>
    %7 = vector.shape_cast %6 : vector<8xf32> to vector<8x1xf32>
    %cst_6 = arith.constant 3.200000e+01 : f32
    %8 = vector.broadcast %cst_6 : f32 to vector<8x1xf32>
    %9 = arith.divf %7, %8 : vector<8x1xf32>
    %10 = vector.broadcast %9 : vector<8x1xf32> to vector<8x32xf32>
    %11 = arith.subf %1, %10 : vector<8x32xf32>
    %12 = arith.mulf %11, %11 : vector<8x32xf32>
    %cst_7 = arith.constant dense<0.000000e+00> : vector<8xf32>
    %13 = vector.multi_reduction <add>, %12, %cst_7 [1] : vector<8x32xf32> to vector<8xf32>
    %14 = vector.shape_cast %13 : vector<8xf32> to vector<8x1xf32>
    %cst_8 = arith.constant 3.200000e+01 : f32
    %15 = vector.broadcast %cst_8 : f32 to vector<8x1xf32>
    %16 = arith.divf %14, %15 : vector<8x1xf32>
    %cst_9 = arith.constant 9.99999974E-6 : f32
    %17 = vector.broadcast %cst_9 : f32 to vector<8x1xf32>
    %18 = arith.addf %16, %17 : vector<8x1xf32>
    %19 = math.rsqrt %18 : vector<8x1xf32>
    %20 = vector.broadcast %19 : vector<8x1xf32> to vector<8x32xf32>
    %21 = arith.mulf %11, %20 : vector<8x32xf32>
    %22 = vector.shape_cast %3 : vector<32xf32> to vector<1x32xf32>
    %23 = vector.broadcast %22 : vector<1x32xf32> to vector<8x32xf32>
    %24 = arith.mulf %21, %23 : vector<8x32xf32>
    %25 = vector.shape_cast %5 : vector<32xf32> to vector<1x32xf32>
    %26 = vector.broadcast %25 : vector<1x32xf32> to vector<8x32xf32>
    %27 = arith.addf %24, %26 : vector<8x32xf32>
    %28 = arith.truncf %27 : vector<8x32xf32> to vector<8x32xbf16>
    %c0_10 = arith.constant 0 : index
    %c0_11 = arith.constant 0 : index
    %29 = vector.load %arg5[%c0_10, %c0_11] : memref<32x96xbf16, #tpu.memory_space<vmem>>, vector<32x96xbf16>
    %cst_12 = arith.constant dense<0.000000e+00> : vector<8x96xf32>
    %30 = tpu.matmul %28, %29, %cst_12 {dimension_numbers = #tpu.dot_dimension_numbers<[1], [0], [0], [1], [0, 0, 1, 1], [], []>} : vector<8x32xbf16>, vector<32x96xbf16>, vector<8x96xf32> -> vector<8x96xf32>
    %c0_13 = arith.constant 0 : index
    %c0_14 = arith.constant 0 : index
    %31 = vector.load %arg6[%c0_13, %c0_14] : memref<1x96xf32, #tpu.memory_space<vmem>>, vector<1x96xf32>
    %32 = vector.shape_cast %31 : vector<1x96xf32> to vector<96xf32>
    %33 = vector.shape_cast %32 : vector<96xf32> to vector<1x96xf32>
    %34 = vector.broadcast %33 : vector<1x96xf32> to vector<8x96xf32>
    %35 = arith.addf %30, %34 : vector<8x96xf32>
    %36 = vector.extract_strided_slice %35 {offsets = [0, 0], sizes = [8, 32], strides = [1, 1]} : vector<8x96xf32> to vector<8x32xf32>
    %cst_15 = arith.constant 0.353553385 : f32
    %37 = vector.broadcast %cst_15 : f32 to vector<8x32xf32>
    %38 = arith.mulf %36, %37 : vector<8x32xf32>
    %39 = arith.truncf %38 : vector<8x32xf32> to vector<8x32xbf16>
    %c0_16 = arith.constant 0 : index
    %c0_17 = arith.constant 0 : index
    %c0_18 = arith.constant 0 : index
    %40 = vector.load %arg7[%c0_16, %c0_17, %c0_18] : memref<1x8x32xbf16, #tpu.memory_space<vmem>>, vector<1x8x32xbf16>
    %41 = vector.shape_cast %40 : vector<1x8x32xbf16> to vector<8x32xbf16>
    %42 = vector.shape_cast %39 : vector<8x32xbf16> to vector<1x8x32xbf16>
    tpu.vector_store %arg7[%c0_16, %c0_17, %c0_18], %42 {strides = array<i32>} : memref<1x8x32xbf16, #tpu.memory_space<vmem>>, vector<1x8x32xbf16>,
    %43 = vector.extract_strided_slice %35 {offsets = [0, 32], sizes = [8, 32], strides = [1, 1]} : vector<8x96xf32> to vector<8x32xf32>
    %44 = arith.truncf %43 : vector<8x32xf32> to vector<8x32xbf16>
    %c0_19 = arith.constant 0 : index
    %c0_20 = arith.constant 0 : index
    %c0_21 = arith.constant 0 : index
    %45 = vector.load %arg8[%c0_19, %c0_20, %c0_21] : memref<1x8x32xbf16, #tpu.memory_space<vmem>>, vector<1x8x32xbf16>
    %46 = vector.shape_cast %45 : vector<1x8x32xbf16> to vector<8x32xbf16>
    %47 = vector.shape_cast %44 : vector<8x32xbf16> to vector<1x8x32xbf16>
    tpu.vector_store %arg8[%c0_19, %c0_20, %c0_21], %47 {strides = array<i32>} : memref<1x8x32xbf16, #tpu.memory_space<vmem>>, vector<1x8x32xbf16>,
    %48 = vector.extract_strided_slice %35 {offsets = [0, 64], sizes = [8, 32], strides = [1, 1]} : vector<8x96xf32> to vector<8x32xf32>
    %49 = arith.truncf %48 : vector<8x32xf32> to vector<8x32xbf16>
    %c0_22 = arith.constant 0 : index
    %c0_23 = arith.constant 0 : index
    %c0_24 = arith.constant 0 : index
    %50 = vector.load %arg9[%c0_22, %c0_23, %c0_24] : memref<1x8x32xbf16, #tpu.memory_space<vmem>>, vector<1x8x32xbf16>
    %51 = vector.shape_cast %50 : vector<1x8x32xbf16> to vector<8x32xbf16>
    %52 = vector.shape_cast %49 : vector<8x32xbf16> to vector<1x8x32xbf16>
    tpu.vector_store %arg9[%c0_22, %c0_23, %c0_24], %52 {strides = array<i32>} : memref<1x8x32xbf16, #tpu.memory_space<vmem>>, vector<1x8x32xbf16>,
    return
  }
  func.func @transform_0(%arg0: i32, %arg1: i32) -> (i32, i32, i32) {
    %c0_i32 = arith.constant 0 : i32
    %c0_i32_0 = arith.constant 0 : i32
    return %arg0, %arg1, %c0_i32 : i32, i32, i32
  }
  func.func @transform_1(%arg0: i32, %arg1: i32) -> (i32, i32) {
    %c0_i32 = arith.constant 0 : i32
    %c0_i32_0 = arith.constant 0 : i32
    %c0_i32_1 = arith.constant 0 : i32
    return %c0_i32, %c0_i32_0 : i32, i32
  }
  func.func @transform_2(%arg0: i32, %arg1: i32) -> (i32, i32) {
    %c0_i32 = arith.constant 0 : i32
    %c0_i32_0 = arith.constant 0 : i32
    %c0_i32_1 = arith.constant 0 : i32
    return %c0_i32, %c0_i32_0 : i32, i32
  }
  func.func @transform_3(%arg0: i32, %arg1: i32) -> (i32, i32) {
    %c0_i32 = arith.constant 0 : i32
    %c0_i32_0 = arith.constant 0 : i32
    %c0_i32_1 = arith.constant 0 : i32
    return %c0_i32, %c0_i32_0 : i32, i32
  }
  func.func @transform_4(%arg0: i32, %arg1: i32) -> (i32, i32) {
    %c0_i32 = arith.constant 0 : i32
    %c0_i32_0 = arith.constant 0 : i32
    %c0_i32_1 = arith.constant 0 : i32
    return %c0_i32, %c0_i32_0 : i32, i32
  }
  func.func @transform_5(%arg0: i32, %arg1: i32) -> (i32, i32, i32) {
    %c0_i32 = arith.constant 0 : i32
    %c0_i32_0 = arith.constant 0 : i32
    return %arg0, %arg1, %c0_i32 : i32, i32, i32
  }
  func.func @transform_6(%arg0: i32, %arg1: i32) -> (i32, i32, i32) {
    %c0_i32 = arith.constant 0 : i32
    %c0_i32_0 = arith.constant 0 : i32
    return %arg0, %arg1, %c0_i32 : i32, i32, i32
  }
  func.func @transform_7(%arg0: i32, %arg1: i32) -> (i32, i32, i32) {
    %c0_i32 = arith.constant 0 : i32
    %c0_i32_0 = arith.constant 0 : i32
    return %arg0, %arg1, %c0_i32 : i32, i32, i32
  }
}

</mosaic_0001>

<bundles_post_ra>
// kernel: tpu_custom_call.1
= control target key start
LH: loop header
LB: loop body
LE: loop exit
PB: predicated region body
PF: predicated region fallthrough
CT: control target
= control target key end

     0   :  { %s1368_s0 = inlined_call_operand.hbm [shape: f32[2,8,32], index: 0, kind: input, shape index: {}]   ;;  %s1369_s1 = inlined_call_operand.vmem [shape: f32[1,32], index: 1, kind: input, shape index: {}]   ;;  %s1370_s2 = inlined_call_operand.vmem [shape: f32[1,32], index: 2, kind: input, shape index: {}]   ;;  %s1371_s3 = inlined_call_operand.hbm [shape: bf16[32,96], index: 3, kind: input, shape index: {}]   ;;  %s1372_s4 = inlined_call_operand.vmem [shape: f32[1,96], index: 4, kind: input, shape index: {}]   ;;  %s1373_s5 = inlined_call_operand.hbm [shape: bf16[2,8,32], index: 5, kind: output, shape index: {0}]   ;;  %s1374_s6 = inlined_call_operand.hbm [shape: bf16[2,8,32], index: 6, kind: output, shape index: {1}]   ;;  %s1375_s7 = inlined_call_operand.hbm [shape: bf16[2,8,32], index: 7, kind: output, shape index: {2}]  }
   0x1   :  { %1381 = sst [smem:[#allocation16_spill]] %s1371_s3 }
   0x2   :  { %13 = vsyncpa [#allocation3], 0 }
   0x3   :  { %15 = vsyncpa [#allocation3 + $0x1], 0 }
   0x4   :  { %16 = vsyncpa [#allocation6], 0 }
   0x5   :  { %17 = vsyncpa [#allocation4], 0 }
   0x6   :  { %19 = vsyncpa [#allocation4 + $0x1], 0 }
   0x7   :  { %20 = vsyncpa [#allocation9], 0 }
   0x8   :  { %22 = vsyncpa [#allocation9 + $0x1], 0  ;;  %s1060_s24 = smov 0   ;;  %s1062_s25 = smov 0  }
   0x9   :  { %s1064_s26 = smov 0   ;;  %s1066_s27 = smov 0  }
   0xa   :  { %s1068_s28 = smov 0   ;;  %s1070_s29 = smov 0  }
   0xb LB: > { %s1091_s30 = sadd.s32 4294967295, %s1007_s29   ;;  %s1379_s8 = sadd.s32 4294967294, %s1007_s29   ;;  %s1007_s29 = sphi %s1070_s29, %s28_s29   ;;  %s1003_s28 = sphi %s1068_s28, %s1404_s28   ;;  %s999_s27 = sphi %s1066_s27, %s1403_s27   ;;  %s995_s26 = sphi %s1064_s26, %s1402_s26   ;;  %s991_s25 = sphi %s1062_s25, %s1401_s25   ;;  %s987_s24 = sphi %s1060_s24, %s1400_s24  }
   0xc   : > { %p62_p0 = scmp.ne.s32.totalorder %s991_s25, %s987_s24  ;;  %p1376_p1 = scmp.eq.s32.totalorder %s1091_s30, 0 }
   0xd   : > { %p178_p3 = scmp.eq.s32.totalorder %s1379_s8, 1  ;;  %p672_p5 = scmp.ge.s32.totalorder %s1007_s29, 1 }
   0xe   : > { %p1102_p4 = por %p1376_p1, %p62_p0  ;;  %p241_p7 = scmp.lt.s32.totalorder %s1007_s29, 3 }
   0xf   : > { %p1107_p6 = por %p178_p3, %p62_p0  ;;  %s1009_s12 = smov [#allocation5]  }
  0x10   : > { %s1382_s9 = scalar_select %p1102_p4, 1, 0 }
  0x11   : > { %s1383_s10 = scalar_select %p1107_p6, 1, 0 }
  0x12   : > { %p1112_p8 = pnand %p672_p5, %p241_p7  ;;  %s259_s13 = sshll.u32 %s1009_s12, 4  ;;  %s260_s13 = int_to_ptr.vmem [resolvable:$true] %s259_s13 }
  0x13   : > { %s40_s15 = sadd.s32 1, %s1003_s28  ;;  %s1386_s3 = sld [smem:[#allocation16_spill]] }
  0x14   : > { %s1384_s11 = scalar_select %p1112_p8, 1, 0 }
  0x15   : > { %p722_p9 = pneg %p1112_p8 }
  0x17   : > { %p1121_p11 = pnand %p722_p9, %p1376_p1 }
  0x19   : > { %s803_s18 = scalar_lea.hbm %s1386_s3, 256  ;;  %p805_p13 = pneg %p1121_p11 }
  0x1a   : > { %p804_p12 = scmp.ne.s32.totalorder %s1386_s3, %s803_s18  ;;  %p810_p5 = scmp.lt.u32.totalorder %s803_s18, %s1386_s3 }
  0x1c   : > { %p806_p0 = pnand %p805_p13, %p804_p12 }
  0x1e   : > { %p807_p3 = pneg %p806_p0 }
  0x20   : > { %p812_p7 = pnand %p810_p5, %p807_p3 }
  0x22   : > { %815 = shalt.err (!%p812_p7)
}
  0x23   : > { %s816_s23 = scalar_lea.vmem %s260_s13, 256  ;;  %p824_p2 = scmp.lt.s32.totalorder %s260_s13, %s260_s13 }
  0x24   : > { %p817_p9 = scmp.ne.s32.totalorder %s260_s13, %s816_s23  ;;  %p825_p6 = scmp.lt.s32.totalorder %s816_s23, %s816_s23 }
  0x26   : > { %p819_p10 = pnand %p817_p9, %p805_p13  ;;  %p826_p4 = por %p825_p6, %p824_p2 }
  0x28   : > { %p820_p1 = pneg %p819_p10 }
  0x2a   : > { %p827_p8 = pnand %p826_p4, %p820_p1 }
  0x2c   : > { %830 = shalt.err (!%p827_p8)
}
  0x2d   : > { %s1010_s12 = smov 64   ;;  %s1011_s16 = smov 4  }
  0x2e   : > { %725 = dma.hbm_to_vmem [thread:$0]  (!%p1121_p11), %s1386_s3, 256, %s260_s13, [#allocation6], %s1010_s12, %s1010_s12, %s1011_s16  }
  0x2f   : > { %p42_p1 = scmp.ge.s32.totalorder %s40_s15, 2  ;;  %s49_s19 = sadd.s32 1, %s995_s26 }
  0x30   : > { %p56_p2 = scmp.ne.s32.totalorder %s995_s26, %s991_s25  ;;  %p57_p4 = scmp.eq.s32.totalorder %s1007_s29, 0 }
  0x31   : > { %s1406_s15 = smov (%p42_p1, %s40_s15), 0  ;;  %p1389_p8 = scmp.eq.s32.totalorder %s1091_s30, 1 }
  0x32   : > { %1387 = sst [smem:[#allocation15_spill]] %s1406_s15  ;;  %p1148_p6 = por %p57_p4, %p56_p2 }
  0x33   : > { %p1154_p10 = por %p1389_p8, %p56_p2  ;;  %s44_s14 = ssub.s32 %s1003_s28, %s1406_s15 }
  0x34   : > { %p741_p12 = scmp.lt.s32.totalorder %s1007_s29, 2  ;;  %p47_p11 = scmp.eq.s32.totalorder %s44_s14, 0 }
  0x35   : > { %s276_s13 = sand.u32 1, %s995_s26   ;;  %s676_s12 = sshll.u32 %s1003_s28, 7 }
  0x36   : > { %s675_s22 = sshll.u32 %s276_s13, 3  ;;  %s1169_s18 = scalar_lea.hbm %s1368_s0, %s676_s12 }
  0x37   : > { %s1163_s23 = scalar_select %p47_p11, %s995_s26, %s49_s19  }
  0x38   : > { %s280_s8 = scalar_lea.vmem [#allocation2], %s675_s22  ;;  %p1175_p13 = pnand %p741_p12, %p1148_p6 }
  0x39   : > { %s288_s3 = sshll.u32 %s280_s8, 4  ;;  %s277_s19 = scalar_lea.sflag [#allocation3], %s276_s13  ;;  %s1171_s3 = int_to_ptr.vmem [resolvable:$true] %s288_s3 }
  0x3a   : > { %s831_s15 = scalar_lea.hbm %s1169_s18, 128  ;;  %p833_p3 = pneg %p1175_p13 }
  0x3b   : > { %p832_p0 = scmp.ne.s32.totalorder %s1169_s18, %s831_s15  ;;  %s836_s12 = scalar_lea.hbm %s1368_s0, 256 }
  0x3c   : > { %p837_p9 = scmp.lt.u32.totalorder %s1169_s18, %s1368_s0  ;;  %p838_p1 = scmp.lt.u32.totalorder %s836_s12, %s831_s15 }
  0x3d   : > { %p834_p5 = pnand %p833_p3, %p832_p0  ;;  %p840_p4 = scmp.lt.u32.totalorder %s831_s15, %s1169_s18 }
  0x3e   : > { %p839_p2 = por %p838_p1, %p837_p9 }
  0x3f   : > { %p835_p7 = pneg %p834_p5 }
  0x40   : > { %p841_p6 = por %p840_p4, %p839_p2 }
  0x42   : > { %p842_p8 = pnand %p841_p6, %p835_p7 }
  0x44   : > { %845 = shalt.err (!%p842_p8)
}
  0x45   : > { %s846_s13 = scalar_lea.vmem %s1171_s3, 128  ;;  %s1012_s17 = smov [#allocation2]  }
  0x46   : > { %p847_p12 = scmp.ne.s32.totalorder %s1171_s3, %s846_s13  ;;  %s851_s22 = sshll.u32 %s1012_s17, 4  ;;  %s852_s22 = int_to_ptr.vmem [resolvable:$false] %s851_s22 }
  0x47   : > { %s853_s8 = scalar_lea.vmem %s852_s22, 256  ;;  %p854_p5 = scmp.lt.s32.totalorder %s1171_s3, %s852_s22 }
  0x48   : > { %p849_p11 = pnand %p847_p12, %p833_p3  ;;  %p855_p9 = scmp.lt.s32.totalorder %s853_s8, %s846_s13 }
  0x4a   : > { %p850_p0 = pneg %p849_p11  ;;  %p856_p1 = por %p855_p9, %p854_p5 }
  0x4c   : > { %p857_p2 = pnand %p856_p1, %p850_p0 }
  0x4e   : > { %860 = shalt.err (!%p857_p2)
}
  0x4f   : > { %729 = dma.hbm_to_vmem [thread:$0]  (!%p1175_p13), %s1169_s18, 128, %s1171_s3, %s277_s19  }
  0x50   : > { %p1392_p7 = scmp.ne.s32.totalorder %s1384_s11, 0 }
  0x51   : > { %s1207_s15 = sand.u32 (!%p1392_p7), 1, %s991_s25   ;;  %p1393_p3 = scmp.ne.s32.totalorder (!%p1392_p7), %s1382_s9, 0 }
  0x52   : > { %297 = sbr.rel (%p1392_p7) target bundleno = 777 (0x309), region = 40  ;;  %s678_s12 = sshll.u32 (!%p1392_p7), %s1207_s15, 3 }
  0x53   : > { %s300_s20 = scalar_lea.sflag (!%p1392_p7), [#allocation3], %s1207_s15  ;;  %s303_s16 = scalar_lea.vmem (!%p1392_p7), [#allocation2], %s678_s12 }
  0x59   : > { %970 = dma.done.wait (%p1393_p3), %s300_s20, 128  }
  0x5a   : > { %972 = vsyncadd (%p1393_p3), %s300_s20, 4294967168  ;;  %p1394_p4 = scmp.eq.s32.totalorder %s1091_s30, 0 }
  0x5c   : > { %974 = dma.done.wait (%p1394_p4), [#allocation6], 256   ;;  %p1395_p13 = pmov %p1394_p4 }
  0x5d   : > { %vm352_vm0 = vcmask 261120   ;;  %v349_v0 = vld [vmem:[%s303_s16] sm:$0xff]  ;;  %v799_v7 = vld [vmem:[#allocation5] sm:$0xff]   ;;  %v1013_v8 = vmov 0.0   ;;  %v800_v9 = vld [vmem:[#allocation5 + $0x8] sm:$0xff]   ;;  %vm1014_vm1 = vmmov 0  }
  0x5e   : > { %976 = vsyncadd (%p1395_p13), [#allocation6], 4294967040  ;;  %v353_v1 = vsel %vm352_vm0, %v349_v0, 0.0  ;;  %702 = vmatprep.subr.bf16.mxu0 %v1013_v8  ;;  %706 = vmatprep.mubr.msk.bf16.mxu0 %vm1014_vm1, %v1013_v8  ;;  %v683_v14 = vld [vmem:[%s1369_s1] ss:$0 sm:$0xff]  ;;  %s1232_s13 = sshll.u32 %s1207_s15, 2 }
  0x5f   : > { %354 = vadd.xlane.f32.xlu0 %v353_v1  ;;  %703 = vmatpush3.bf16.msra.mxu0 %v799_v7  ;;  %v684_v16 = vld [vmem:[%s1370_s2] ss:$0 sm:$0xff]  ;;  %s1235_s17 = sshll.u32 %s999_s27, 6  ;;  %s333_s22 = scalar_lea.vmem [#allocation7], %s1232_s13  ;;  %vm450_vm2 = vcmask 257024  }
  0x60   : > { %704 = vmatprep.subr.bf16.mxu0 %v1013_v8  ;;  %v685_v20 = vld [vmem:[%s1372_s4] ss:$0 sm:$0xff]  ;;  %s489_s8 = sshll.u32 %s333_s22, 4  ;;  %s1015_s12 = smov 96   ;;  %s1244_s8 = int_to_ptr.vmem [resolvable:$true] %s489_s8 }
  0x61   : > { %s1242_s3 = scalar_lea.hbm %s1373_s5, %s1235_s17  ;;  %s465_s27 = scalar_lea.sflag [#allocation4], %s1207_s15 }
  0x62   : > { %s861_s9 = scalar_lea.vmem %s1244_s8, 64  ;;  %s1016_s11 = smov [#allocation7]  }
  0x63   : > { %705 = vmatpush3.bf16.msra.mxu0 %v800_v9  ;;  %p862_p6 = scmp.ne.s32.totalorder %s1244_s8, %s861_s9  ;;  %s865_s18 = sshll.u32 %s1016_s11, 4  ;;  %s866_s18 = int_to_ptr.vmem [resolvable:$false] %s865_s18 }
  0x64   : > { %s867_s14 = scalar_lea.vmem %s866_s18, 128  ;;  %p868_p11 = scmp.lt.s32.totalorder %s1244_s8, %s866_s18 }
  0x65   : > { %p863_p8 = pnand %p862_p6, %p1154_p10  ;;  %p869_p0 = scmp.lt.s32.totalorder %s867_s14, %s861_s9 }
  0x67   : > { %p864_p12 = pneg %p863_p8  ;;  %p870_p5 = por %p869_p0, %p868_p11 }
  0x69   : > { %p871_p9 = pnand %p870_p5, %p864_p12 }
  0xec   : > { %v355_v2 = vpop.xlane.xlu0 %354 }
  0xed   : > { %v357_v3 = vmul.f32 0.03125, %v355_v2 }
  0xef   : > { %v358_v4 = vsub.f32 %v349_v0, %v357_v3 }
  0xf1   : > { %v359_v5 = vmul.f32 %v358_v4, %v358_v4 }
  0xf3   : > { %v360_v6 = vsel %vm352_vm0, %v359_v5, 0.0 }
  0xf4   : > { %361 = vadd.xlane.f32.xlu0 %v360_v6 }
 0x181   : > { %v362_v10 = vpop.xlane.xlu0 %361 }
 0x182   : > { %v363_v11 = vmul.f32 0.03125, %v362_v10 }
 0x184   : > { %v364_v12 = vadd.f32 1e-05, %v363_v11 }
 0x186   : > { %801 = vrsqrt.f32 %v364_v12 }
 0x190   : > { %v802_v13 = vpop.eup %801 }
 0x191   : > { %v366_v15 = vmul.f32 %v802_v13, %v358_v4 }
 0x193   : > { %v373_v17 = vmul.f32 %v683_v14, %v366_v15 }
 0x195   : > { %v380_v18 = vadd.f32 %v684_v16, %v373_v17 }
 0x197   : > { %v381_v19 = vpack.c.bf16 %v380_v18, %v380_v18 }
 0x199   : > { %707 = vmatmul.mubr.msk.bf16.vlgmr.msra.gmra.mrb[0].mxu0 %vm352_vm0, %v381_v19 }
 0x26c   : > { %v442_v21 = vpop.f32.mrb[0].mxu0 }
 0x26d   : > { %v443_v22 = vadd.f32 %v685_v20, %v442_v21  ;;  %v708_v23 = vpop.f32.mrb[1].mxu0 }
 0x26e   : > { %v445_v24 = vpop.f32.mrb[2].mxu0 }
 0x26f   : > { %v448_v25 = vmul.f32 0.35355338, %v443_v22  ;;  %v709_v26 = vpop.f32.mrb[3].mxu0  ;;  %v698_v27 = vpack.c.bf16 %v443_v22, %v443_v22 }
 0x271   : > { %v449_v28 = vpack.c.bf16 %v448_v25, %v448_v25  ;;  %456 = vrot.lane.b32.xlu1 %v698_v27, %s1015_s12 }
 0x273   : > { %451 = vst.msk [vmem:[%s333_s22] sm:$0xf] %vm450_vm2, %v449_v28 }
 0x274   : > { %874 = shalt.err (!%p871_p9)
}
 0x275   : > { %s875_s15 = scalar_lea.hbm %s1242_s3, 64  ;;  %s879_s12 = scalar_lea.hbm %s1373_s5, 128 }
 0x276   : > { %p876_p1 = scmp.ne.s32.totalorder %s1242_s3, %s875_s15  ;;  %p880_p3 = scmp.lt.u32.totalorder %s1242_s3, %s1373_s5 }
 0x277   : > { %p881_p4 = scmp.lt.u32.totalorder %s879_s12, %s875_s15  ;;  %p883_p6 = scmp.lt.u32.totalorder %s875_s15, %s1242_s3 }
 0x278   : > { %p877_p2 = pnand %p876_p1, %p1154_p10 }
 0x279   : > { %p882_p13 = por %p881_p4, %p880_p3 }
 0x27a   : > { %p878_p7 = pneg %p877_p2 }
 0x27b   : > { %p884_p8 = por %p883_p6, %p882_p13 }
 0x27d   : > { %p885_p12 = pnand %p884_p8, %p878_p7 }
 0x27f   : > { %888 = shalt.err (!%p885_p12)
}
 0x280   : > { %716 = dma.vmem_to_hbm [thread:$0]  (%p1154_p10), %s1244_s8, 64, %s1242_s3, %s465_s27  }
 0x281   : > { %s1017_s9 = smov 64   ;;  %s469_s11 = sand.u32 1, %s1091_s30  }
 0x282   : > { %460 = vrot.lane.b32.xlu1 %v698_v27, %s1017_s9  ;;  %s340_s18 = scalar_lea.vmem [#allocation8], %s1232_s13  ;;  %s1275_s22 = scalar_lea.hbm %s1374_s6, %s1235_s17 }
 0x283   : > { %s503_s14 = sshll.u32 %s340_s18, 4  ;;  %s347_s12 = scalar_lea.vmem [#allocation10], %s1232_s13  ;;  %s1277_s14 = int_to_ptr.vmem [resolvable:$true] %s503_s14 }
 0x284   : > { %s1282_s20 = sshll.u32 %s347_s12, 4  ;;  %s1285_s30 = scalar_lea.sflag [#allocation9], %s469_s11  ;;  %s1316_s20 = int_to_ptr.vmem [resolvable:$true] %s1282_s20 }
 0x285   : > { %s889_s8 = scalar_lea.vmem %s1277_s14, 64  ;;  %s1018_s3 = smov [#allocation8]  }
 0x286   : > { %p890_p11 = scmp.ne.s32.totalorder %s1277_s14, %s889_s8  ;;  %s893_s27 = sshll.u32 %s1018_s3, 4  ;;  %s894_s27 = int_to_ptr.vmem [resolvable:$false] %s893_s27 }
 0x287   : > { %s895_s16 = scalar_lea.vmem %s894_s27, 128  ;;  %p896_p9 = scmp.lt.s32.totalorder %s1277_s14, %s894_s27 }
 0x288   : > { %p891_p0 = pnand %p890_p11, %p1154_p10  ;;  %p897_p1 = scmp.lt.s32.totalorder %s895_s16, %s889_s8 }
 0x28a   : > { %p892_p5 = pneg %p891_p0  ;;  %p898_p2 = por %p897_p1, %p896_p9 }
 0x28c   : > { %p899_p7 = pnand %p898_p2, %p892_p5 }
 0x2e3   : > { %v457_v29 = vpop.permute.xlu1 %456 }
 0x2e4   : > { %459 = vst.msk [vmem:[%s340_s18] sm:$0xf] %vm450_vm2, %v457_v29 }
 0x2e5   : > { %902 = shalt.err (!%p899_p7)
}
 0x2e6   : > { %s903_s9 = scalar_lea.hbm %s1275_s22, 64  ;;  %s907_s15 = scalar_lea.hbm %s1374_s6, 128 }
 0x2e7   : > { %p904_p3 = scmp.ne.s32.totalorder %s1275_s22, %s903_s9  ;;  %p908_p6 = scmp.lt.u32.totalorder %s1275_s22, %s1374_s6 }
 0x2e8   : > { %p909_p8 = scmp.lt.u32.totalorder %s907_s15, %s903_s9  ;;  %p911_p11 = scmp.lt.u32.totalorder %s903_s9, %s1275_s22 }
 0x2e9   : > { %p905_p4 = pnand %p904_p3, %p1154_p10 }
 0x2ea   : > { %p910_p12 = por %p909_p8, %p908_p6 }
 0x2eb   : > { %p906_p13 = pneg %p905_p4 }
 0x2ec   : > { %p912_p0 = por %p911_p11, %p910_p12 }
 0x2ee   : > { %p913_p5 = pnand %p912_p0, %p906_p13 }
 0x2f0   : > { %916 = shalt.err (!%p913_p5)
}
 0x2f1   : > { %717 = dma.vmem_to_hbm [thread:$0]  (%p1154_p10), %s1277_s14, 64, %s1275_s22, %s1285_s30  }
 0x2f2   : > { %s1313_s16 = scalar_lea.hbm %s1375_s7, %s1235_s17  ;;  %s917_s9 = scalar_lea.vmem %s1316_s20, 64 }
 0x2f3   : > { %p918_p9 = scmp.ne.s32.totalorder %s1316_s20, %s917_s9  ;;  %s1019_s14 = smov [#allocation10]  }
 0x2f4   : > { %v461_v30 = vpop.permute.xlu1 %460  ;;  %s921_s22 = sshll.u32 %s1019_s14, 4  ;;  %s922_s22 = int_to_ptr.vmem [resolvable:$false] %s921_s22 }
 0x2f5   : > { %463 = vst.msk [vmem:[%s347_s12] sm:$0xf] %vm450_vm2, %v461_v30  ;;  %p919_p1 = pnand %p918_p9, %p1154_p10  ;;  %s923_s11 = scalar_lea.vmem %s922_s22, 128 }
 0x2f6   : > { %p924_p7 = scmp.lt.s32.totalorder %s1316_s20, %s922_s22  ;;  %p925_p3 = scmp.lt.s32.totalorder %s923_s11, %s917_s9 }
 0x2f7   : > { %p920_p2 = pneg %p919_p1 }
 0x2f8   : > { %p926_p4 = por %p925_p3, %p924_p7 }
 0x2fa   : > { %p927_p13 = pnand %p926_p4, %p920_p2 }
 0x2fc   : > { %930 = shalt.err (!%p927_p13)
}
 0x2fd   : > { %s931_s13 = scalar_lea.hbm %s1313_s16, 64  ;;  %s935_s18 = scalar_lea.hbm %s1375_s7, 128 }
 0x2fe   : > { %p932_p6 = scmp.ne.s32.totalorder %s1313_s16, %s931_s13  ;;  %p936_p11 = scmp.lt.u32.totalorder %s1313_s16, %s1375_s7 }
 0x2ff   : > { %p937_p0 = scmp.lt.u32.totalorder %s935_s18, %s931_s13  ;;  %p939_p9 = scmp.lt.u32.totalorder %s931_s13, %s1313_s16 }
 0x300   : > { %p933_p8 = pnand %p932_p6, %p1154_p10 }
 0x301   : > { %p938_p5 = por %p937_p0, %p936_p11 }
 0x302   : > { %p934_p12 = pneg %p933_p8 }
 0x303   : > { %p940_p1 = por %p939_p9, %p938_p5 }
 0x305   : > { %p941_p2 = pnand %p940_p1, %p934_p12 }
 0x307   : > { %944 = shalt.err (!%p941_p2)
}
 0x308   : > { %718 = dma.vmem_to_hbm [thread:$0]  (%p1154_p10), %s1316_s20, 64, %s1313_s16, %s1285_s30  }
 0x309 PF: > { %s529_s3 = sand.u32 1, %s987_s24   ;;  %p1396_p7 = scmp.ne.s32.totalorder %s1383_s10, 0 }
 0x30a   : > { %p1397_p3 = scmp.ge.s32.totalorder %s1007_s29, 2  ;;  %s530_s8 = scalar_lea.sflag [#allocation4], %s529_s3 }
 0x30c   : > { %p731_p4 = pnand %p1397_p3, %p1396_p7 }
 0x30e   : > { %978 = dma.done.wait (!%p731_p4), %s530_s8, 64  }
 0x30f   : > { %980 = vsyncadd (!%p731_p4), %s530_s8, 4294967232  ;;  %s1398_s27 = sadd.s32 4294967294, %s1007_s29  }
 0x310   : > { %s538_s9 = sand.u32 1, %s1398_s27  }
 0x311   : > { %s539_s14 = scalar_lea.sflag [#allocation9], %s538_s9 }
 0x312   : > { %982 = dma.done.wait (!%p731_p4), %s539_s14, 128  }
 0x313   : > { %984 = vsyncadd (!%p731_p4), %s539_s14, 4294967168  ;;  %s28_s29 = sadd.s32 1, %s1007_s29   ;;  %s1399_s21 = sld [smem:[#allocation15_spill]] }
 0x314   : > { %p25_p10 = scmp.ge.s32.totalorder %s28_s29, 4   ;;  %s1400_s24 = smov %s991_s25 }
 0x315   : > { %s1401_s25 = smov %s995_s26  ;;  %s1402_s26 = smov %s1163_s23 }
 0x316   : > { %s1403_s27 = smov %s1003_s28  ;;  %27 = sbr.rel (!%p25_p10) target bundleno = 11 (0xb), region = 121 }
 0x319   : > { %s1404_s28 = smov %s1399_s21 }
 0x31d   :  { %553 = vsyncpa [#allocation3], 1 }
 0x31e   :  { %555 = vsyncpa [#allocation3 + $0x1], 1 }
 0x31f   :  { %556 = vsyncpa [#allocation6], 1 }
 0x320   :  { %557 = vsyncpa [#allocation4], 1 }
 0x321   :  { %559 = vsyncpa [#allocation4 + $0x1], 1 }
 0x322   :  { %560 = vsyncpa [#allocation9], 1 }
 0x323   :  { %562 = vsyncpa [#allocation9 + $0x1], 1 }

</bundles_post_ra>
